<compile_context>
chip_gen: v7x
topology: tpu7x:2x2x1
jax: 0.10.0
libtpu: 0.0.40
codegen_flags: <defaults>
</compile_context>

<pallas_src>
import jax
import jax.numpy as jnp
import numpy as np
from jax import lax
from jax.experimental import pallas as pl
from jax.experimental.pallas import tpu as pltpu


_TAPS = tuple((dy, dx) for dy in (-1, 0, 1) for dx in (-1, 0, 1))


def _make_kernel(H, W, C, Cpad, L, last_relu, matmul_dtype):
    log2w = W.bit_length() - 1
    need_zero = Cpad != C          # pad rows exist in the tap stack

    def tap_masks():
        # lane index -> in-image (i, j) via bit ops (H, W are powers of two).
        # Only 4 base (1, L) masks are kept live; corner taps multiply two.
        lane = lax.broadcasted_iota(jnp.int32, (1, L), 1)
        j = lane & (W - 1)
        i = (lane >> log2w) & (H - 1)
        row = {-1: jnp.where(i >= 1, 1.0, 0.0),
               0: None,
               1: jnp.where(i < H - 1, 1.0, 0.0)}
        col = {-1: jnp.where(j >= 1, 1.0, 0.0),
               0: None,
               1: jnp.where(j < W - 1, 1.0, 0.0)}
        return row, col

    def conv3x3(act, w_ref, stack_ref, row_m, col_m):
        # act: (C, L) f32 flat activation, L = B*H*W on the lane axis.
        # Each tap = pltpu.roll (XLU slot) of the flat activation + boundary
        # mask; taps are packed into the (9*Cpad, L) VMEM scratch at 8-aligned
        # sublane offsets, then contracted with ONE K = 9*Cpad MXU matmul.
        for t, (dy, dx) in enumerate(_TAPS):
            s = dy * W + dx
            shifted = act if s == 0 else pltpu.roll(act, shift=(-s) % L, axis=1)
            if row_m[dy] is not None:
                shifted = shifted * row_m[dy]
            if col_m[dx] is not None:
                shifted = shifted * col_m[dx]
            stack_ref[pl.ds(t * Cpad, C), :] = shifted
        stacked = stack_ref[...].astype(matmul_dtype)
        return jnp.dot(w_ref[...], stacked, preferred_element_type=jnp.float32)

    def kernel(x_ref, wa_ref, wb_ref, ba_ref, bb_ref, out_ref, stack_ref):
        if need_zero:
            # Pad rows of the tap stack meet zero weight columns, but stale
            # VMEM could hold NaN/Inf — zero every step (also correct when the
            # "parallel" grid is sharded across TensorCores).
            stack_ref[...] = jnp.zeros_like(stack_ref)
        x = x_ref[...]                                   # (C, L) f32 lane-dense
        row_m, col_m = tap_masks()
        y = conv3x3(x, wa_ref, stack_ref, row_m, col_m)  # conv_a (bn_a scale folded)
        y = jnp.maximum(y + ba_ref[...], 0.0)            # bn_a bias + relu
        y = conv3x3(y, wb_ref, stack_ref, row_m, col_m)  # conv_b (bn_b scale folded)
        y = y + bb_ref[...] + x                          # bn_b bias + residual
        if last_relu:
            y = jnp.maximum(y, 0.0)
        out_ref[...] = y.astype(out_ref.dtype)

    return kernel


def _fold_bn_to_mat(w_oihw, gamma, beta, mean, var, eps, cpad, matmul_dtype):
    """Fold eval-mode BN into the conv and lay the weight out lane-dense.

    Returns a (Cout, 9*cpad) weight (tap-major, input-channel minor, zero
    padded to `cpad` per tap — matching the in-kernel tap stack) and a
    (Cout, 1) f32 bias.
    """
    O, I = w_oihw.shape[0], w_oihw.shape[1]
    scale = gamma / jnp.sqrt(var + eps)                         # (O,)
    bias = beta - mean * scale                                  # (O,)
    w = jnp.transpose(w_oihw.astype(jnp.float32), (0, 2, 3, 1))  # (O,3,3,I)
    w = w * scale[:, None, None, None]
    w = w.reshape(O, 9, I)
    w = jnp.pad(w, ((0, 0), (0, 0), (0, cpad - I)))
    return (w.reshape(O, 9 * cpad).astype(matmul_dtype),
            bias.reshape(-1, 1).astype(jnp.float32))


def residual_block_flat(x_flat, params, *, H, W, last_relu=False, eps=1e-5,
                        images_per_block=None, matmul_dtype=jnp.float32):
    """ResidualBlock forward on lane-dense (C, N*H*W) activations.

    Call this directly when chaining several blocks of a stage so the
    NCHW <-> flat relayout (two extra HBM passes) is paid once per stage.
    """
    C, NHW = x_flat.shape
    HW = H * W
    assert NHW % HW == 0
    N = NHW // HW
    assert H > 0 and W > 0 and (H & (H - 1)) == 0 and (W & (W - 1)) == 0, \
        "in-kernel boundary masks require power-of-two H, W"

    if images_per_block is None:
        # Legal chunks: divisor of N whose lane extent is 128-aligned (or the
        # full batch). Prefer >=2 grid steps (pipelining + v7x dual-TC), then
        # the largest lane extent <= 1024 so intermediates stay vreg-resident.
        legal = [b for b in range(1, N + 1)
                 if N % b == 0 and ((b * HW) % 128 == 0 or b == N)]
        multi = [b for b in legal if N // b >= 2] or legal
        capped = [b for b in multi if b * HW <= 1024] or [min(multi)]
        images_per_block = max(capped)
    B = images_per_block
    assert N % B == 0 and (B == N or (B * HW) % 128 == 0), \
        "images_per_block must divide N with a 128-aligned lane extent"
    L = B * HW
    Cpad = -(-C // 8) * 8          # 8-aligned per-tap slot in the stacked operand

    x_flat = x_flat.astype(jnp.float32)
    wa, ba = _fold_bn_to_mat(params["conv_a_w"], params["bn_a_gamma"],
                             params["bn_a_beta"], params["bn_a_mean"],
                             params["bn_a_var"], eps, Cpad, matmul_dtype)
    wb, bb = _fold_bn_to_mat(params["conv_b_w"], params["bn_b_gamma"],
                             params["bn_b_beta"], params["bn_b_mean"],
                             params["bn_b_var"], eps, Cpad, matmul_dtype)

    kernel = _make_kernel(H, W, C, Cpad, L, last_relu, matmul_dtype)

    # Explicit VMEM budget (v7x: 64 MiB physical / 32 MiB default scoped).
    wbytes = C * 9 * Cpad * jnp.dtype(matmul_dtype).itemsize
    est = (4 * C * L * 4            # x + out blocks, double-buffered
           + 9 * Cpad * L * 4       # stacked-tap scratch
           + 4 * wbytes             # both weights, double-buffered
           + 4 * C * 4 * 2)         # biases
    vmem_limit = int(min(32 << 20, max(4 << 20, 4 * est)))

    out_flat = pl.pallas_call(
        kernel,
        out_shape=jax.ShapeDtypeStruct((C, NHW), jnp.float32),
        grid_spec=pltpu.PrefetchScalarGridSpec(
            num_scalar_prefetch=0,
            grid=(N // B,),
            in_specs=[
                pl.BlockSpec((C, L), lambda n: (0, n)),          # x (lane-dense)
                pl.BlockSpec((C, 9 * Cpad), lambda n: (0, 0)),   # conv_a weight
                pl.BlockSpec((C, 9 * Cpad), lambda n: (0, 0)),   # conv_b weight
                pl.BlockSpec((C, 1), lambda n: (0, 0)),          # bn_a bias
                pl.BlockSpec((C, 1), lambda n: (0, 0)),          # bn_b bias
            ],
            out_specs=pl.BlockSpec((C, L), lambda n: (0, n)),
            scratch_shapes=[pltpu.VMEM((9 * Cpad, L), jnp.float32)]),
        compiler_params=pltpu.CompilerParams(
            dimension_semantics=("parallel",),
            vmem_limit_bytes=vmem_limit),
    )(x_flat, wa, wb, ba, bb)
    return out_flat


def residual_block(x_nchw, params, *, last_relu=False, eps=1e-5,
                   images_per_block=None, matmul_dtype=jnp.float32):
    """NCHW convenience wrapper around residual_block_flat."""
    N, C, H, W = x_nchw.shape
    x_flat = jnp.transpose(x_nchw, (1, 0, 2, 3)).reshape(C, N * H * W)
    out_flat = residual_block_flat(
        x_flat, params, H=H, W=W, last_relu=last_relu, eps=eps,
        images_per_block=images_per_block, matmul_dtype=matmul_dtype)
    return jnp.transpose(out_flat.reshape(C, N, H, W), (1, 0, 2, 3))


def reference_nchw(x, params, *, last_relu=False, eps=1e-5):
    """Pure-JAX reference mirroring the PyTorch forward (eval-mode BN)."""
    dn = ("NCHW", "OIHW", "NCHW")

    def bn(y, g, b, m, v):
        s = g / jnp.sqrt(v + eps)
        return y * s[None, :, None, None] + (b - m * s)[None, :, None, None]

    y = lax.conv_general_dilated(x, params["conv_a_w"], (1, 1),
                                 ((1, 1), (1, 1)), dimension_numbers=dn)
    y = bn(y, params["bn_a_gamma"], params["bn_a_beta"],
           params["bn_a_mean"], params["bn_a_var"])
    y = jnp.maximum(y, 0.0)
    y = lax.conv_general_dilated(y, params["conv_b_w"], (1, 1),
                                 ((1, 1), (1, 1)), dimension_numbers=dn)
    y = bn(y, params["bn_b_gamma"], params["bn_b_beta"],
           params["bn_b_mean"], params["bn_b_var"])
    y = x + y
    if last_relu:
        y = jnp.maximum(y, 0.0)
    return y


if __name__ == "__main__":
    key = jax.random.PRNGKey(0)
    k = jax.random.split(key, 12)
    N, C, H, W = 2, 4, 16, 16                  # inplanes=4, increase_dim=False
    x = jax.random.normal(k[0], (N, C, H, W), jnp.float32)
    params = {
        "conv_a_w": 0.2 * jax.random.normal(k[1], (C, C, 3, 3), jnp.float32),
        "conv_b_w": 0.2 * jax.random.normal(k[2], (C, C, 3, 3), jnp.float32),
        "bn_a_gamma": 1.0 + 0.1 * jax.random.normal(k[3], (C,), jnp.float32),
        "bn_a_beta": 0.1 * jax.random.normal(k[4], (C,), jnp.float32),
        "bn_a_mean": 0.1 * jax.random.normal(k[5], (C,), jnp.float32),
        "bn_a_var": jax.random.uniform(k[6], (C,), jnp.float32, 0.5, 1.5),
        "bn_b_gamma": 1.0 + 0.1 * jax.random.normal(k[7], (C,), jnp.float32),
        "bn_b_beta": 0.1 * jax.random.normal(k[8], (C,), jnp.float32),
        "bn_b_mean": 0.1 * jax.random.normal(k[9], (C,), jnp.float32),
        "bn_b_var": jax.random.uniform(k[10], (C,), jnp.float32, 0.5, 1.5),
    }

    # f32 path, auto block (B=1 -> grid=(2,)): tight check against the reference.
    ref = reference_nchw(x, params, last_relu=False)
    out = jax.block_until_ready(residual_block(x, params, last_relu=False))
    assert out.shape == (N, C, H, W)
    np.testing.assert_allclose(np.asarray(out), np.asarray(ref),
                               rtol=1e-4, atol=1e-4)

    # last_relu=True branch.
    ref_r = reference_nchw(x, params, last_relu=True)
    out_r = jax.block_until_ready(residual_block(x, params, last_relu=True))
    np.testing.assert_allclose(np.asarray(out_r), np.asarray(ref_r),
                               rtol=1e-4, atol=1e-4)

    # Explicit full-batch block (single grid step path).
    out_full = jax.block_until_ready(
        residual_block(x, params, last_relu=False, images_per_block=N))
    np.testing.assert_allclose(np.asarray(out_full), np.asarray(ref),
                               rtol=1e-4, atol=1e-4)

    # bf16 MXU-operand variant (f32 accumulation / elementwise).
    out_bf = jax.block_until_ready(
        residual_block(x, params, last_relu=False, matmul_dtype=jnp.bfloat16))
    np.testing.assert_allclose(np.asarray(out_bf), np.asarray(ref),
                               rtol=5e-2, atol=5e-2)

    print("KERNEL_OK")
</pallas_src>

<mosaic_0001>
module attributes {stable_mosaic.version = 11 : i64} {
  func.func @kernel(%arg0: i32, %arg1: memref<4x256xf32, #tpu.memory_space<vmem>>, %arg2: memref<4x72xf32, #tpu.memory_space<vmem>>, %arg3: memref<4x72xf32, #tpu.memory_space<vmem>>, %arg4: memref<4x1xf32, #tpu.memory_space<vmem>>, %arg5: memref<4x1xf32, #tpu.memory_space<vmem>>, %arg6: memref<4x256xf32, #tpu.memory_space<vmem>>, %arg7: memref<72x256xf32, #tpu.memory_space<vmem>>) attributes {dimension_semantics = [#tpu.dimension_semantics<parallel>], iteration_bounds = array<i64: 2>, scalar_prefetch = 0 : i64, scratch_operands = 1 : i64, tpu.core_type = #tpu.core_type<tc>, window_params = [{transform_indices = @transform_0, window_bounds = array<i64: 4, 256>}, {pipeline_mode = #tpu.pipeline_mode<synchronous>, transform_indices = @transform_1, window_bounds = array<i64: 4, 72>}, {pipeline_mode = #tpu.pipeline_mode<synchronous>, transform_indices = @transform_2, window_bounds = array<i64: 4, 72>}, {pipeline_mode = #tpu.pipeline_mode<synchronous>, transform_indices = @transform_3, window_bounds = array<i64: 4, 1>}, {pipeline_mode = #tpu.pipeline_mode<synchronous>, transform_indices = @transform_4, window_bounds = array<i64: 4, 1>}, {transform_indices = @transform_5, window_bounds = array<i64: 4, 256>}]} {
    %cst = arith.constant 0.000000e+00 : f32
    %0 = vector.broadcast %cst : f32 to vector<72x256xf32>
    %c0 = arith.constant 0 : index
    %c0_0 = arith.constant 0 : index
    %1 = vector.load %arg7[%c0, %c0_0] : memref<72x256xf32, #tpu.memory_space<vmem>>, vector<72x256xf32>
    tpu.vector_store %arg7[%c0, %c0_0], %0 {strides = array<i32>} : memref<72x256xf32, #tpu.memory_space<vmem>>, vector<72x256xf32>,
    %c0_1 = arith.constant 0 : index
    %c0_2 = arith.constant 0 : index
    %2 = vector.load %arg1[%c0_1, %c0_2] : memref<4x256xf32, #tpu.memory_space<vmem>>, vector<4x256xf32>
    %3 = tpu.iota {dimensions = array<i32: 1>} : vector<1x256xi32>
    %c15_i32 = arith.constant 15 : i32
    %4 = vector.broadcast %c15_i32 : i32 to vector<1x256xi32>
    %5 = arith.andi %3, %4 : vector<1x256xi32>
    %c4_i32 = arith.constant 4 : i32
    %6 = vector.broadcast %c4_i32 : i32 to vector<1x256xi32>
    %7 = arith.shrsi %3, %6 : vector<1x256xi32>
    %c15_i32_3 = arith.constant 15 : i32
    %8 = vector.broadcast %c15_i32_3 : i32 to vector<1x256xi32>
    %9 = arith.andi %7, %8 : vector<1x256xi32>
    %c1_i32 = arith.constant 1 : i32
    %10 = vector.broadcast %c1_i32 : i32 to vector<1x256xi32>
    %11 = arith.cmpi sge, %9, %10 : vector<1x256xi32>
    %cst_4 = arith.constant 1.000000e+00 : f32
    %cst_5 = arith.constant 0.000000e+00 : f32
    %12 = vector.broadcast %cst_4 : f32 to vector<1x256xf32>
    %13 = vector.broadcast %cst_5 : f32 to vector<1x256xf32>
    %14 = arith.select %11, %12, %13 : vector<1x256xi1>, vector<1x256xf32>
    %c15_i32_6 = arith.constant 15 : i32
    %15 = vector.broadcast %c15_i32_6 : i32 to vector<1x256xi32>
    %16 = arith.cmpi slt, %9, %15 : vector<1x256xi32>
    %cst_7 = arith.constant 1.000000e+00 : f32
    %cst_8 = arith.constant 0.000000e+00 : f32
    %17 = vector.broadcast %cst_7 : f32 to vector<1x256xf32>
    %18 = vector.broadcast %cst_8 : f32 to vector<1x256xf32>
    %19 = arith.select %16, %17, %18 : vector<1x256xi1>, vector<1x256xf32>
    %c1_i32_9 = arith.constant 1 : i32
    %20 = vector.broadcast %c1_i32_9 : i32 to vector<1x256xi32>
    %21 = arith.cmpi sge, %5, %20 : vector<1x256xi32>
    %cst_10 = arith.constant 1.000000e+00 : f32
    %cst_11 = arith.constant 0.000000e+00 : f32
    %22 = vector.broadcast %cst_10 : f32 to vector<1x256xf32>
    %23 = vector.broadcast %cst_11 : f32 to vector<1x256xf32>
    %24 = arith.select %21, %22, %23 : vector<1x256xi1>, vector<1x256xf32>
    %c15_i32_12 = arith.constant 15 : i32
    %25 = vector.broadcast %c15_i32_12 : i32 to vector<1x256xi32>
    %26 = arith.cmpi slt, %5, %25 : vector<1x256xi32>
    %cst_13 = arith.constant 1.000000e+00 : f32
    %cst_14 = arith.constant 0.000000e+00 : f32
    %27 = vector.broadcast %cst_13 : f32 to vector<1x256xf32>
    %28 = vector.broadcast %cst_14 : f32 to vector<1x256xf32>
    %29 = arith.select %26, %27, %28 : vector<1x256xi1>, vector<1x256xf32>
    %c17_i32 = arith.constant 17 : i32
    %30 = tpu.dynamic_rotate %2 by %c17_i32 dim 1 : vector<4x256xf32>, i32 -> vector<4x256xf32>
    %31 = vector.broadcast %14 : vector<1x256xf32> to vector<4x256xf32>
    %32 = arith.mulf %30, %31 : vector<4x256xf32>
    %33 = vector.broadcast %24 : vector<1x256xf32> to vector<4x256xf32>
    %34 = arith.mulf %32, %33 : vector<4x256xf32>
    %c0_15 = arith.constant 0 : index
    %c0_16 = arith.constant 0 : index
    %35 = vector.load %arg7[%c0_15, %c0_16] : memref<72x256xf32, #tpu.memory_space<vmem>>, vector<4x256xf32>
    tpu.vector_store %arg7[%c0_15, %c0_16], %34 {strides = array<i32>} : memref<72x256xf32, #tpu.memory_space<vmem>>, vector<4x256xf32>,
    %c16_i32 = arith.constant 16 : i32
    %36 = tpu.dynamic_rotate %2 by %c16_i32 dim 1 : vector<4x256xf32>, i32 -> vector<4x256xf32>
    %37 = vector.broadcast %14 : vector<1x256xf32> to vector<4x256xf32>
    %38 = arith.mulf %36, %37 : vector<4x256xf32>
    %c8 = arith.constant 8 : index
    %c0_17 = arith.constant 0 : index
    %39 = vector.load %arg7[%c8, %c0_17] : memref<72x256xf32, #tpu.memory_space<vmem>>, vector<4x256xf32>
    tpu.vector_store %arg7[%c8, %c0_17], %38 {strides = array<i32>} : memref<72x256xf32, #tpu.memory_space<vmem>>, vector<4x256xf32>,
    %c15_i32_18 = arith.constant 15 : i32
    %40 = tpu.dynamic_rotate %2 by %c15_i32_18 dim 1 : vector<4x256xf32>, i32 -> vector<4x256xf32>
    %41 = vector.broadcast %14 : vector<1x256xf32> to vector<4x256xf32>
    %42 = arith.mulf %40, %41 : vector<4x256xf32>
    %43 = vector.broadcast %29 : vector<1x256xf32> to vector<4x256xf32>
    %44 = arith.mulf %42, %43 : vector<4x256xf32>
    %c16 = arith.constant 16 : index
    %c0_19 = arith.constant 0 : index
    %45 = vector.load %arg7[%c16, %c0_19] : memref<72x256xf32, #tpu.memory_space<vmem>>, vector<4x256xf32>
    tpu.vector_store %arg7[%c16, %c0_19], %44 {strides = array<i32>} : memref<72x256xf32, #tpu.memory_space<vmem>>, vector<4x256xf32>,
    %c1_i32_20 = arith.constant 1 : i32
    %46 = tpu.dynamic_rotate %2 by %c1_i32_20 dim 1 : vector<4x256xf32>, i32 -> vector<4x256xf32>
    %47 = vector.broadcast %24 : vector<1x256xf32> to vector<4x256xf32>
    %48 = arith.mulf %46, %47 : vector<4x256xf32>
    %c24 = arith.constant 24 : index
    %c0_21 = arith.constant 0 : index
    %49 = vector.load %arg7[%c24, %c0_21] : memref<72x256xf32, #tpu.memory_space<vmem>>, vector<4x256xf32>
    tpu.vector_store %arg7[%c24, %c0_21], %48 {strides = array<i32>} : memref<72x256xf32, #tpu.memory_space<vmem>>, vector<4x256xf32>,
    %c32 = arith.constant 32 : index
    %c0_22 = arith.constant 0 : index
    %50 = vector.load %arg7[%c32, %c0_22] : memref<72x256xf32, #tpu.memory_space<vmem>>, vector<4x256xf32>
    tpu.vector_store %arg7[%c32, %c0_22], %2 {strides = array<i32>} : memref<72x256xf32, #tpu.memory_space<vmem>>, vector<4x256xf32>,
    %c255_i32 = arith.constant 255 : i32
    %51 = tpu.dynamic_rotate %2 by %c255_i32 dim 1 : vector<4x256xf32>, i32 -> vector<4x256xf32>
    %52 = vector.broadcast %29 : vector<1x256xf32> to vector<4x256xf32>
    %53 = arith.mulf %51, %52 : vector<4x256xf32>
    %c40 = arith.constant 40 : index
    %c0_23 = arith.constant 0 : index
    %54 = vector.load %arg7[%c40, %c0_23] : memref<72x256xf32, #tpu.memory_space<vmem>>, vector<4x256xf32>
    tpu.vector_store %arg7[%c40, %c0_23], %53 {strides = array<i32>} : memref<72x256xf32, #tpu.memory_space<vmem>>, vector<4x256xf32>,
    %c241_i32 = arith.constant 241 : i32
    %55 = tpu.dynamic_rotate %2 by %c241_i32 dim 1 : vector<4x256xf32>, i32 -> vector<4x256xf32>
    %56 = vector.broadcast %19 : vector<1x256xf32> to vector<4x256xf32>
    %57 = arith.mulf %55, %56 : vector<4x256xf32>
    %58 = vector.broadcast %24 : vector<1x256xf32> to vector<4x256xf32>
    %59 = arith.mulf %57, %58 : vector<4x256xf32>
    %c48 = arith.constant 48 : index
    %c0_24 = arith.constant 0 : index
    %60 = vector.load %arg7[%c48, %c0_24] : memref<72x256xf32, #tpu.memory_space<vmem>>, vector<4x256xf32>
    tpu.vector_store %arg7[%c48, %c0_24], %59 {strides = array<i32>} : memref<72x256xf32, #tpu.memory_space<vmem>>, vector<4x256xf32>,
    %c240_i32 = arith.constant 240 : i32
    %61 = tpu.dynamic_rotate %2 by %c240_i32 dim 1 : vector<4x256xf32>, i32 -> vector<4x256xf32>
    %62 = vector.broadcast %19 : vector<1x256xf32> to vector<4x256xf32>
    %63 = arith.mulf %61, %62 : vector<4x256xf32>
    %c56 = arith.constant 56 : index
    %c0_25 = arith.constant 0 : index
    %64 = vector.load %arg7[%c56, %c0_25] : memref<72x256xf32, #tpu.memory_space<vmem>>, vector<4x256xf32>
    tpu.vector_store %arg7[%c56, %c0_25], %63 {strides = array<i32>} : memref<72x256xf32, #tpu.memory_space<vmem>>, vector<4x256xf32>,
    %c239_i32 = arith.constant 239 : i32
    %65 = tpu.dynamic_rotate %2 by %c239_i32 dim 1 : vector<4x256xf32>, i32 -> vector<4x256xf32>
    %66 = vector.broadcast %19 : vector<1x256xf32> to vector<4x256xf32>
    %67 = arith.mulf %65, %66 : vector<4x256xf32>
    %68 = vector.broadcast %29 : vector<1x256xf32> to vector<4x256xf32>
    %69 = arith.mulf %67, %68 : vector<4x256xf32>
    %c64 = arith.constant 64 : index
    %c0_26 = arith.constant 0 : index
    %70 = vector.load %arg7[%c64, %c0_26] : memref<72x256xf32, #tpu.memory_space<vmem>>, vector<4x256xf32>
    tpu.vector_store %arg7[%c64, %c0_26], %69 {strides = array<i32>} : memref<72x256xf32, #tpu.memory_space<vmem>>, vector<4x256xf32>,
    %c0_27 = arith.constant 0 : index
    %c0_28 = arith.constant 0 : index
    %71 = vector.load %arg7[%c0_27, %c0_28] : memref<72x256xf32, #tpu.memory_space<vmem>>, vector<72x256xf32>
    %c0_29 = arith.constant 0 : index
    %c0_30 = arith.constant 0 : index
    %72 = vector.load %arg2[%c0_29, %c0_30] : memref<4x72xf32, #tpu.memory_space<vmem>>, vector<4x72xf32>
    %cst_31 = arith.constant dense<0.000000e+00> : vector<4x256xf32>
    %73 = tpu.matmul %72, %71, %cst_31 {dimension_numbers = #tpu.dot_dimension_numbers<[1], [0], [0], [1], [0, 0, 1, 1], [], []>} : vector<4x72xf32>, vector<72x256xf32>, vector<4x256xf32> -> vector<4x256xf32>
    %c0_32 = arith.constant 0 : index
    %c0_33 = arith.constant 0 : index
    %74 = vector.load %arg4[%c0_32, %c0_33] : memref<4x1xf32, #tpu.memory_space<vmem>>, vector<4x1xf32>
    %75 = vector.broadcast %74 : vector<4x1xf32> to vector<4x256xf32>
    %76 = arith.addf %73, %75 : vector<4x256xf32>
    %cst_34 = arith.constant 0.000000e+00 : f32
    %77 = vector.broadcast %cst_34 : f32 to vector<4x256xf32>
    %78 = arith.maximumf %76, %77 : vector<4x256xf32>
    %c17_i32_35 = arith.constant 17 : i32
    %79 = tpu.dynamic_rotate %78 by %c17_i32_35 dim 1 : vector<4x256xf32>, i32 -> vector<4x256xf32>
    %80 = vector.broadcast %14 : vector<1x256xf32> to vector<4x256xf32>
    %81 = arith.mulf %79, %80 : vector<4x256xf32>
    %82 = vector.broadcast %24 : vector<1x256xf32> to vector<4x256xf32>
    %83 = arith.mulf %81, %82 : vector<4x256xf32>
    %c0_36 = arith.constant 0 : index
    %c0_37 = arith.constant 0 : index
    %84 = vector.load %arg7[%c0_36, %c0_37] : memref<72x256xf32, #tpu.memory_space<vmem>>, vector<4x256xf32>
    tpu.vector_store %arg7[%c0_36, %c0_37], %83 {strides = array<i32>} : memref<72x256xf32, #tpu.memory_space<vmem>>, vector<4x256xf32>,
    %c16_i32_38 = arith.constant 16 : i32
    %85 = tpu.dynamic_rotate %78 by %c16_i32_38 dim 1 : vector<4x256xf32>, i32 -> vector<4x256xf32>
    %86 = vector.broadcast %14 : vector<1x256xf32> to vector<4x256xf32>
    %87 = arith.mulf %85, %86 : vector<4x256xf32>
    %c8_39 = arith.constant 8 : index
    %c0_40 = arith.constant 0 : index
    %88 = vector.load %arg7[%c8_39, %c0_40] : memref<72x256xf32, #tpu.memory_space<vmem>>, vector<4x256xf32>
    tpu.vector_store %arg7[%c8_39, %c0_40], %87 {strides = array<i32>} : memref<72x256xf32, #tpu.memory_space<vmem>>, vector<4x256xf32>,
    %c15_i32_41 = arith.constant 15 : i32
    %89 = tpu.dynamic_rotate %78 by %c15_i32_41 dim 1 : vector<4x256xf32>, i32 -> vector<4x256xf32>
    %90 = vector.broadcast %14 : vector<1x256xf32> to vector<4x256xf32>
    %91 = arith.mulf %89, %90 : vector<4x256xf32>
    %92 = vector.broadcast %29 : vector<1x256xf32> to vector<4x256xf32>
    %93 = arith.mulf %91, %92 : vector<4x256xf32>
    %c16_42 = arith.constant 16 : index
    %c0_43 = arith.constant 0 : index
    %94 = vector.load %arg7[%c16_42, %c0_43] : memref<72x256xf32, #tpu.memory_space<vmem>>, vector<4x256xf32>
    tpu.vector_store %arg7[%c16_42, %c0_43], %93 {strides = array<i32>} : memref<72x256xf32, #tpu.memory_space<vmem>>, vector<4x256xf32>,
    %c1_i32_44 = arith.constant 1 : i32
    %95 = tpu.dynamic_rotate %78 by %c1_i32_44 dim 1 : vector<4x256xf32>, i32 -> vector<4x256xf32>
    %96 = vector.broadcast %24 : vector<1x256xf32> to vector<4x256xf32>
    %97 = arith.mulf %95, %96 : vector<4x256xf32>
    %c24_45 = arith.constant 24 : index
    %c0_46 = arith.constant 0 : index
    %98 = vector.load %arg7[%c24_45, %c0_46] : memref<72x256xf32, #tpu.memory_space<vmem>>, vector<4x256xf32>
    tpu.vector_store %arg7[%c24_45, %c0_46], %97 {strides = array<i32>} : memref<72x256xf32, #tpu.memory_space<vmem>>, vector<4x256xf32>,
    %c32_47 = arith.constant 32 : index
    %c0_48 = arith.constant 0 : index
    %99 = vector.load %arg7[%c32_47, %c0_48] : memref<72x256xf32, #tpu.memory_space<vmem>>, vector<4x256xf32>
    tpu.vector_store %arg7[%c32_47, %c0_48], %78 {strides = array<i32>} : memref<72x256xf32, #tpu.memory_space<vmem>>, vector<4x256xf32>,
    %c255_i32_49 = arith.constant 255 : i32
    %100 = tpu.dynamic_rotate %78 by %c255_i32_49 dim 1 : vector<4x256xf32>, i32 -> vector<4x256xf32>
    %101 = vector.broadcast %29 : vector<1x256xf32> to vector<4x256xf32>
    %102 = arith.mulf %100, %101 : vector<4x256xf32>
    %c40_50 = arith.constant 40 : index
    %c0_51 = arith.constant 0 : index
    %103 = vector.load %arg7[%c40_50, %c0_51] : memref<72x256xf32, #tpu.memory_space<vmem>>, vector<4x256xf32>
    tpu.vector_store %arg7[%c40_50, %c0_51], %102 {strides = array<i32>} : memref<72x256xf32, #tpu.memory_space<vmem>>, vector<4x256xf32>,
    %c241_i32_52 = arith.constant 241 : i32
    %104 = tpu.dynamic_rotate %78 by %c241_i32_52 dim 1 : vector<4x256xf32>, i32 -> vector<4x256xf32>
    %105 = vector.broadcast %19 : vector<1x256xf32> to vector<4x256xf32>
    %106 = arith.mulf %104, %105 : vector<4x256xf32>
    %107 = vector.broadcast %24 : vector<1x256xf32> to vector<4x256xf32>
    %108 = arith.mulf %106, %107 : vector<4x256xf32>
    %c48_53 = arith.constant 48 : index
    %c0_54 = arith.constant 0 : index
    %109 = vector.load %arg7[%c48_53, %c0_54] : memref<72x256xf32, #tpu.memory_space<vmem>>, vector<4x256xf32>
    tpu.vector_store %arg7[%c48_53, %c0_54], %108 {strides = array<i32>} : memref<72x256xf32, #tpu.memory_space<vmem>>, vector<4x256xf32>,
    %c240_i32_55 = arith.constant 240 : i32
    %110 = tpu.dynamic_rotate %78 by %c240_i32_55 dim 1 : vector<4x256xf32>, i32 -> vector<4x256xf32>
    %111 = vector.broadcast %19 : vector<1x256xf32> to vector<4x256xf32>
    %112 = arith.mulf %110, %111 : vector<4x256xf32>
    %c56_56 = arith.constant 56 : index
    %c0_57 = arith.constant 0 : index
    %113 = vector.load %arg7[%c56_56, %c0_57] : memref<72x256xf32, #tpu.memory_space<vmem>>, vector<4x256xf32>
    tpu.vector_store %arg7[%c56_56, %c0_57], %112 {strides = array<i32>} : memref<72x256xf32, #tpu.memory_space<vmem>>, vector<4x256xf32>,
    %c239_i32_58 = arith.constant 239 : i32
    %114 = tpu.dynamic_rotate %78 by %c239_i32_58 dim 1 : vector<4x256xf32>, i32 -> vector<4x256xf32>
    %115 = vector.broadcast %19 : vector<1x256xf32> to vector<4x256xf32>
    %116 = arith.mulf %114, %115 : vector<4x256xf32>
    %117 = vector.broadcast %29 : vector<1x256xf32> to vector<4x256xf32>
    %118 = arith.mulf %116, %117 : vector<4x256xf32>
    %c64_59 = arith.constant 64 : index
    %c0_60 = arith.constant 0 : index
    %119 = vector.load %arg7[%c64_59, %c0_60] : memref<72x256xf32, #tpu.memory_space<vmem>>, vector<4x256xf32>
    tpu.vector_store %arg7[%c64_59, %c0_60], %118 {strides = array<i32>} : memref<72x256xf32, #tpu.memory_space<vmem>>, vector<4x256xf32>,
    %c0_61 = arith.constant 0 : index
    %c0_62 = arith.constant 0 : index
    %120 = vector.load %arg7[%c0_61, %c0_62] : memref<72x256xf32, #tpu.memory_space<vmem>>, vector<72x256xf32>
    %c0_63 = arith.constant 0 : index
    %c0_64 = arith.constant 0 : index
    %121 = vector.load %arg3[%c0_63, %c0_64] : memref<4x72xf32, #tpu.memory_space<vmem>>, vector<4x72xf32>
    %cst_65 = arith.constant dense<0.000000e+00> : vector<4x256xf32>
    %122 = tpu.matmul %121, %120, %cst_65 {dimension_numbers = #tpu.dot_dimension_numbers<[1], [0], [0], [1], [0, 0, 1, 1], [], []>} : vector<4x72xf32>, vector<72x256xf32>, vector<4x256xf32> -> vector<4x256xf32>
    %c0_66 = arith.constant 0 : index
    %c0_67 = arith.constant 0 : index
    %123 = vector.load %arg5[%c0_66, %c0_67] : memref<4x1xf32, #tpu.memory_space<vmem>>, vector<4x1xf32>
    %124 = vector.broadcast %123 : vector<4x1xf32> to vector<4x256xf32>
    %125 = arith.addf %122, %124 : vector<4x256xf32>
    %126 = arith.addf %125, %2 : vector<4x256xf32>
    %c0_68 = arith.constant 0 : index
    %c0_69 = arith.constant 0 : index
    %127 = vector.load %arg6[%c0_68, %c0_69] : memref<4x256xf32, #tpu.memory_space<vmem>>, vector<4x256xf32>
    tpu.vector_store %arg6[%c0_68, %c0_69], %126 {strides = array<i32>} : memref<4x256xf32, #tpu.memory_space<vmem>>, vector<4x256xf32>,
    return
  }
  func.func @transform_0(%arg0: i32) -> (i32, i32) {
    %c0_i32 = arith.constant 0 : i32
    %c0_i32_0 = arith.constant 0 : i32
    return %c0_i32, %arg0 : i32, i32
  }
  func.func @transform_1(%arg0: i32) -> (i32, i32) {
    %c0_i32 = arith.constant 0 : i32
    %c0_i32_0 = arith.constant 0 : i32
    %c0_i32_1 = arith.constant 0 : i32
    return %c0_i32, %c0_i32_0 : i32, i32
  }
  func.func @transform_2(%arg0: i32) -> (i32, i32) {
    %c0_i32 = arith.constant 0 : i32
    %c0_i32_0 = arith.constant 0 : i32
    %c0_i32_1 = arith.constant 0 : i32
    return %c0_i32, %c0_i32_0 : i32, i32
  }
  func.func @transform_3(%arg0: i32) -> (i32, i32) {
    %c0_i32 = arith.constant 0 : i32
    %c0_i32_0 = arith.constant 0 : i32
    %c0_i32_1 = arith.constant 0 : i32
    return %c0_i32, %c0_i32_0 : i32, i32
  }
  func.func @transform_4(%arg0: i32) -> (i32, i32) {
    %c0_i32 = arith.constant 0 : i32
    %c0_i32_0 = arith.constant 0 : i32
    %c0_i32_1 = arith.constant 0 : i32
    return %c0_i32, %c0_i32_0 : i32, i32
  }
  func.func @transform_5(%arg0: i32) -> (i32, i32) {
    %c0_i32 = arith.constant 0 : i32
    %c0_i32_0 = arith.constant 0 : i32
    return %c0_i32, %arg0 : i32, i32
  }
}

</mosaic_0001>

<bundles_post_ra>
// kernel: tpu_custom_call.1
= control target key start
LH: loop header
LB: loop body
LE: loop exit
PB: predicated region body
PF: predicated region fallthrough
CT: control target
= control target key end

     0   :  { %10 = vsyncpa [#allocation4], 0  ;;  %s1433_s0 = inlined_call_operand.hbm [shape: f32[4,512], index: 0, kind: input, shape index: {}]   ;;  %s1434_s1 = inlined_call_operand.vmem [shape: f32[4,72], index: 1, kind: input, shape index: {}]   ;;  %s1435_s2 = inlined_call_operand.vmem [shape: f32[4,72], index: 2, kind: input, shape index: {}]   ;;  %s1436_s3 = inlined_call_operand.vmem [shape: f32[4,1], index: 3, kind: input, shape index: {}]   ;;  %s1437_s4 = inlined_call_operand.vmem [shape: f32[4,1], index: 4, kind: input, shape index: {}]   ;;  %s1438_s5 = inlined_call_operand.hbm [shape: f32[4,512], index: 5, kind: output, shape index: {}]  }
   0x1   :  { %12 = vsyncpa [#allocation4 + $0x1], 0 }
   0x2   :  { %13 = vsyncpa [#allocation5], 0 }
   0x3   :  { %15 = vsyncpa [#allocation5 + $0x1], 0  ;;  %s1019_s18 = smov 0   ;;  %s1021_s19 = smov 0  }
   0x4   :  { %s1023_s20 = smov 0   ;;  %s1025_s21 = smov 0  }
   0x5 LB: > { %s1040_s22 = sadd.s32 4294967295, %s975_s21   ;;  %s771_s23 = sadd.s32 4294967294, %s975_s21   ;;  %s975_s21 = sphi %s1025_s21, %s1453_s21   ;;  %s971_s20 = sphi %s1023_s20, %s1452_s20   ;;  %s967_s19 = sphi %s1021_s19, %s1451_s19   ;;  %s963_s18 = sphi %s1019_s18, %s1450_s18  }
   0x6   : > { %s1044_s24 = sadd.s32 1, %s975_s21   ;;  %s28_s25 = sadd.s32 1, %s971_s20 }
   0x7   : > { %s25_s26 = ssub.s32 %s975_s21, %s1044_s24  ;;  %p35_p0 = scmp.ne.s32.totalorder %s971_s20, %s967_s19 }
   0x8   : > { %p26_p1 = scmp.eq.s32.totalorder %s25_s26, 0  ;;  %p36_p2 = scmp.eq.s32.totalorder %s975_s21, 0 }
   0x9   : > { %p41_p3 = scmp.ne.s32.totalorder %s967_s19, %s963_s18  ;;  %p42_p4 = scmp.eq.s32.totalorder %s1040_s22, 0 }
   0xa   : > { %s1056_s27 = scalar_select %p26_p1, %s971_s20, %s28_s25  }
   0xb   : > { %p1058_p5 = por %p36_p2, %p35_p0  ;;  %p1062_p6 = por %p42_p4, %p41_p3 }
   0xc   : > { %p149_p7 = scmp.eq.s32.totalorder %s1040_s22, 1  ;;  %p155_p8 = scmp.eq.s32.totalorder %s771_s23, 1 }
   0xd   : > { %p833_p10 = scmp.lt.s32.totalorder %s975_s21, 2  ;;  %s187_s7 = sand.u32 1, %s971_s20  }
   0xe   : > { %p1069_p11 = por %p149_p7, %p35_p0  ;;  %p1073_p12 = por %p155_p8, %p41_p3 }
   0xf   : > { %s787_s8 = sshll.u32 %s975_s21, 7  ;;  %s774_s9 = sshll.u32 %s187_s7, 3 }
  0x10   : > { %s1442_s30 = scalar_select %p1069_p11, 1, 0 }
  0x11   : > { %s1443_s6 = scalar_select %p1073_p12, 1, 0 }
  0x12   : > { %s1082_s12 = scalar_lea.hbm %s1433_s0, %s787_s8  ;;  %s191_s13 = scalar_lea.vmem [#allocation3], %s774_s9 }
  0x13   : > { %s199_s14 = sshll.u32 %s191_s13, 4  ;;  %p1086_p13 = pnand %p833_p10, %p1058_p5  ;;  %s1090_s14 = int_to_ptr.vmem [resolvable:$true] %s199_s14 }
  0x14   : > { %s188_s16 = scalar_lea.sflag [#allocation4], %s187_s7  ;;  %s879_s17 = scalar_lea.hbm %s1082_s12, 128 }
  0x15   : > { %p880_p2 = scmp.ne.s32.totalorder %s1082_s12, %s879_s17  ;;  %p881_p3 = pneg %p1086_p13 }
  0x16   : > { %s884_s26 = scalar_lea.hbm %s1433_s0, 256  ;;  %p885_p5 = scmp.lt.u32.totalorder %s1082_s12, %s1433_s0 }
  0x17   : > { %p882_p4 = pnand %p881_p3, %p880_p2  ;;  %p886_p8 = scmp.lt.u32.totalorder %s884_s26, %s879_s17 }
  0x18   : > { %p888_p9 = scmp.lt.u32.totalorder %s879_s17, %s1082_s12 }
  0x19   : > { %p883_p7 = pneg %p882_p4  ;;  %p887_p10 = por %p886_p8, %p885_p5 }
  0x1b   : > { %p889_p0 = por %p888_p9, %p887_p10 }
  0x1d   : > { %p890_p1 = pnand %p889_p0, %p883_p7 }
  0x1f   : > { %893 = shalt.err (!%p890_p1)
}
  0x20   : > { %s894_s7 = scalar_lea.vmem %s1090_s14, 128  ;;  %s977_s9 = smov [#allocation3]  }
  0x21   : > { %p895_p2 = scmp.ne.s32.totalorder %s1090_s14, %s894_s7  ;;  %s899_s10 = sshll.u32 %s977_s9, 4  ;;  %s900_s10 = int_to_ptr.vmem [resolvable:$false] %s899_s10 }
  0x22   : > { %s901_s11 = scalar_lea.vmem %s900_s10, 256  ;;  %p902_p11 = scmp.lt.s32.totalorder %s1090_s14, %s900_s10 }
  0x23   : > { %p897_p4 = pnand %p895_p2, %p881_p3  ;;  %p903_p5 = scmp.lt.s32.totalorder %s901_s11, %s894_s7 }
  0x25   : > { %p898_p12 = pneg %p897_p4  ;;  %p904_p8 = por %p903_p5, %p902_p11 }
  0x27   : > { %p905_p9 = pnand %p904_p8, %p898_p12 }
  0x29   : > { %908 = shalt.err (!%p905_p9)
}
  0x2a   : > { %828 = dma.hbm_to_vmem [thread:$0]  (!%p1086_p13), %s1082_s12, 128, %s1090_s14, %s188_s16  }
  0x2b   : > { %p1445_p0 = scmp.lt.s32.totalorder %s975_s21, 3  ;;  %p1446_p1 = scmp.ge.s32.totalorder %s975_s21, 1 }
  0x2d   : > { %p205_p3 = pnand %p1446_p1, %p1445_p0 }
  0x2e   : > { %s1124_s13 = sand.u32 (!%p205_p3), 1, %s967_s19  }
  0x2f   : > { %208 = sbr.rel (%p205_p3) target bundleno = 826 (0x33a), region = 40  ;;  %s778_s17 = sshll.u32 (!%p205_p3), %s1124_s13, 3 }
  0x30   : > { %s211_s23 = scalar_lea.sflag (!%p205_p3), [#allocation4], %s1124_s13  ;;  %s214_s15 = scalar_lea.vmem (!%p205_p3), [#allocation3], %s778_s17 }
  0x36   : > { %954 = dma.done.wait (%p1062_p6), %s211_s23, 128  }
  0x37   : > { %956 = vsyncadd (%p1062_p6), %s211_s23, 4294967168  ;;  %v978_v0 = vmov 0.0   ;;  %v1154_v1 = vld [vmem:[%s214_s15] sm:$0xff]  ;;  %s979_s29 = smov 16   ;;  %s980_s12 = smov 17   ;;  %v987_v4 = vmov 0   ;;  %v262_v5 = vlaneseq }
  0x38   : > { %245 = vst [vmem:[#allocation2 + $0x10] sm:$0xff] %v978_v0  ;;  %246 = vst [vmem:[#allocation2 + $0x18] sm:$0xff] %v978_v0  ;;  %481 = vmatprep.mubr.f32.mxu0 %v978_v0  ;;  %672 = vmatprep.mubr.f32.mxu1 %v978_v0  ;;  %v1162_v2 = vcombine.high %v1154_v1, %v1154_v1  ;;  %s981_s14 = smov 15   ;;  %s982_s16 = smov 1   ;;  %v407_v3 = vld [vmem:[%s1436_s3] sm:$0xf] }
  0x39   : > { %243 = vst [vmem:[#allocation2] sm:$0xff] %v978_v0  ;;  %244 = vst [vmem:[#allocation2 + $0x8] sm:$0xff] %v978_v0  ;;  %303 = vrot.lane.b32.xlu1 %v1154_v1, %s979_s29  ;;  %290 = vrot.lane.b32.xlu0 %v1154_v1, %s980_s12  ;;  %s983_s25 = smov 127   ;;  %s984_s26 = smov 113   ;;  %v1197_v6 = vand.u32 127, %v262_v5 }
  0x3a   : > { %247 = vst [vmem:[#allocation2 + $0x20] sm:$0xff] %v978_v0  ;;  %248 = vst [vmem:[#allocation2 + $0x28] sm:$0xff] %v978_v0  ;;  %s985_s28 = smov 112   ;;  %s986_s8 = smov 111   ;;  %877 = vset.pattern.permute.xlu0 %v987_v4 }
  0x3b   : > { %249 = vst [vmem:[#allocation2 + $0x30] sm:$0xff] %v978_v0  ;;  %250 = vst [vmem:[#allocation2 + $0x38] sm:$0xff] %v978_v0  ;;  %v264_v7 = vadd.s32 128, %v1197_v6  ;;  %v267_v8 = vshra.s32 %v1197_v6, 4  ;;  %v265_v14 = vand.u32 15, %v1197_v6  ;;  %vm307_vm2 = vcmp.lt.s32.totalorder %v1197_v6, 16 }
  0x3c   : > { %251 = vst [vmem:[#allocation2 + $0x40] sm:$0xff] %v978_v0  ;;  %252 = vst [vmem:[#allocation2 + $0x48] sm:$0xff] %v978_v0  ;;  %vm318_vm7 = vcmp.lt.s32.totalorder %v1197_v6, 15  ;;  %vm294_vm8 = vcmp.lt.s32.totalorder %v1197_v6, 17  ;;  %vm331_vm9 = vcmp.lt.s32.totalorder %v1197_v6, 1  ;;  %vm344_vm10 = vcmp.lt.s32.totalorder %v1197_v6, 127 }
  0x3d   : > { %253 = vst [vmem:[#allocation2 + $0x50] sm:$0xff] %v978_v0  ;;  %254 = vst [vmem:[#allocation2 + $0x58] sm:$0xff] %v978_v0  ;;  %314 = vrot.lane.b32.xlu0 %v1154_v1, %s981_s14  ;;  %305 = vrot.lane.b32.xlu1 %v1162_v2, %s979_s29  ;;  %v268_v9 = vshra.s32 %v264_v7, 4  ;;  %v1201_v10 = vand.u32 15, %v267_v8  ;;  %v266_v15 = vand.u32 15, %v264_v7  ;;  %vm283_vm3 = vcmp.lt.s32.totalorder %v265_v14, 15 }
  0x3e   : > { %255 = vst [vmem:[#allocation2 + $0x60] sm:$0xff] %v978_v0  ;;  %256 = vst [vmem:[#allocation2 + $0x68] sm:$0xff] %v978_v0  ;;  %vm279_vm4 = vcmp.ge.s32.totalorder %v265_v14, 1  ;;  %v1224_v24 = vsel %vm283_vm3, 1.0, %v978_v0  ;;  %vm355_vm13 = vcmp.lt.s32.totalorder %v1197_v6, 113  ;;  %vm368_vm14 = vcmp.lt.s32.totalorder %v1197_v6, 112 }
  0x3f   : > { %257 = vst [vmem:[#allocation2 + $0x70] sm:$0xff] %v978_v0  ;;  %258 = vst [vmem:[#allocation2 + $0x78] sm:$0xff] %v978_v0  ;;  %v1203_v11 = vand.u32 15, %v268_v9  ;;  %vm271_vm0 = vcmp.ge.s32.totalorder %v1201_v10, 1  ;;  %vm284_vm5 = vcmp.lt.s32.totalorder %v266_v15, 15  ;;  %vm280_vm6 = vcmp.ge.s32.totalorder %v266_v15, 1 }
  0x40   : > { %259 = vst [vmem:[#allocation2 + $0x80] sm:$0xff] %v978_v0  ;;  %260 = vst [vmem:[#allocation2 + $0x88] sm:$0xff] %v978_v0  ;;  %v1210_v16 = vsel %vm271_vm0, 1.0, %v978_v0  ;;  %v1227_v25 = vsel %vm284_vm5, 1.0, %v978_v0  ;;  %v1230_v27 = vsel %vm279_vm4, 1.0, %v978_v0  ;;  %v1233_v28 = vsel %vm280_vm6, 1.0, %v978_v0 }
  0x41   : > { %338 = vst [vmem:[#allocation2 + $0x40] sm:$0xf] %v1154_v1  ;;  %339 = vst [vmem:[#allocation2 + $0x48] sm:$0xf] %v1162_v2  ;;  %316 = vrot.lane.b32.xlu1 %v1162_v2, %s981_s14  ;;  %292 = vrot.lane.b32.xlu0 %v1162_v2, %s980_s12  ;;  %vm272_vm1 = vcmp.ge.s32.totalorder %v1203_v11, 1  ;;  %vm275_vm11 = vcmp.lt.s32.totalorder %v1201_v10, 15 }
  0x42   : > { %v1213_v17 = vsel %vm272_vm1, 1.0, %v978_v0  ;;  %vm276_vm12 = vcmp.lt.s32.totalorder %v1203_v11, 15  ;;  %v1269_v54 = vsel %vm275_vm11, 1.0, %v978_v0  ;;  %vm379_vm15 = vcmp.lt.s32.totalorder %v1197_v6, 111  ;;  %s687_s7 = scalar_lea.sflag [#allocation5], %s1124_s13  ;;  %p1447_p11 = scmp.ne.s32.totalorder %s1442_s30, 0 }
  0x43   : > { %v1272_v55 = vsel %vm276_vm12, 1.0, %v978_v0  ;;  %vm413_vm0 = vcmask 588800  }
  0x45   : > { %329 = vrot.lane.b32.xlu1 %v1162_v2, %s982_s16  ;;  %327 = vrot.lane.b32.xlu0 %v1154_v1, %s982_s16 }
  0x49   : > { %342 = vrot.lane.b32.xlu1 %v1162_v2, %s983_s25  ;;  %340 = vrot.lane.b32.xlu0 %v1154_v1, %s983_s25 }
  0x4d   : > { %353 = vrot.lane.b32.xlu1 %v1162_v2, %s984_s26  ;;  %351 = vrot.lane.b32.xlu0 %v1154_v1, %s984_s26 }
  0x51   : > { %366 = vrot.lane.b32.xlu1 %v1162_v2, %s985_s28  ;;  %364 = vrot.lane.b32.xlu0 %v1154_v1, %s985_s28 }
  0x55   : > { %377 = vrot.lane.b32.xlu1 %v1162_v2, %s986_s8  ;;  %375 = vrot.lane.b32.xlu0 %v1154_v1, %s986_s8 }
  0x59   : > { %410 = vperm.xlu0 %877, %v407_v3  }
  0xab   : > { %v304_v12 = vpop.permute.xlu1 %303  ;;  %v291_v13 = vpop.permute.xlu0 %290 }
  0xaf   : > { %v315_v18 = vpop.permute.xlu0 %314  ;;  %v306_v19 = vpop.permute.xlu1 %305 }
  0xb0   : > { %v308_v20 = vsel %vm307_vm2, %v304_v12, %v306_v19  ;;  %v309_v21 = vsel %vm307_vm2, %v306_v19, %v304_v12  ;;  %v397_v19 = vld [vmem:[#allocation2 + $0x48] sm:$0xff] }
  0xb1   : > { %v310_v22 = vmul.f32 %v309_v21, %v1210_v16  ;;  %v311_v23 = vmul.f32 %v308_v20, %v1213_v17 }
  0xb3   : > { %312 = vst [vmem:[#allocation2 + $0x10] sm:$0xf] %v310_v22  ;;  %313 = vst [vmem:[#allocation2 + $0x18] sm:$0xf] %v311_v23  ;;  %v317_v26 = vpop.permute.xlu1 %316  ;;  %v293_v29 = vpop.permute.xlu0 %292 }
  0xb4   : > { %v319_v30 = vsel %vm318_vm7, %v315_v18, %v317_v26  ;;  %v320_v31 = vsel %vm318_vm7, %v317_v26, %v315_v18  ;;  %v295_v32 = vsel %vm294_vm8, %v291_v13, %v293_v29  ;;  %v296_v33 = vsel %vm294_vm8, %v293_v29, %v291_v13 }
  0xb5   : > { %v321_v34 = vmul.f32 %v320_v31, %v1210_v16  ;;  %v322_v35 = vmul.f32 %v319_v30, %v1213_v17  ;;  %v297_v36 = vmul.f32 %v296_v33, %v1210_v16  ;;  %v298_v37 = vmul.f32 %v295_v32, %v1213_v17  ;;  %v396_v32 = vld [vmem:[#allocation2 + $0x40] sm:$0xff] }
  0xb7   : > { %v323_v38 = vmul.f32 %v321_v34, %v1224_v24  ;;  %v324_v39 = vmul.f32 %v322_v35, %v1227_v25  ;;  %v299_v40 = vmul.f32 %v297_v36, %v1230_v27  ;;  %v300_v41 = vmul.f32 %v298_v37, %v1233_v28  ;;  %v330_v42 = vpop.permute.xlu1 %329  ;;  %v328_v43 = vpop.permute.xlu0 %327 }
  0xb8   : > { %v332_v44 = vsel %vm331_vm9, %v328_v43, %v330_v42  ;;  %v333_v45 = vsel %vm331_vm9, %v330_v42, %v328_v43 }
  0xb9   : > { %325 = vst [vmem:[#allocation2 + $0x20] sm:$0xf] %v323_v38  ;;  %326 = vst [vmem:[#allocation2 + $0x28] sm:$0xf] %v324_v39  ;;  %v334_v46 = vmul.f32 %v333_v45, %v1230_v27  ;;  %v335_v47 = vmul.f32 %v332_v44, %v1233_v28 }
  0xba   : > { %301 = vst [vmem:[#allocation2] sm:$0xf] %v299_v40  ;;  %302 = vst [vmem:[#allocation2 + $0x8] sm:$0xf] %v300_v41  ;;  %v391_v58 = vld [vmem:[#allocation2 + $0x18] sm:$0xff]  ;;  %v390_v63 = vld [vmem:[#allocation2 + $0x10] sm:$0xff] }
  0xbb   : > { %336 = vst [vmem:[#allocation2 + $0x30] sm:$0xf] %v334_v46  ;;  %337 = vst [vmem:[#allocation2 + $0x38] sm:$0xf] %v335_v47  ;;  %v343_v48 = vpop.permute.xlu1 %342  ;;  %v341_v49 = vpop.permute.xlu0 %340 }
  0xbc   : > { %v345_v50 = vsel %vm344_vm10, %v341_v49, %v343_v48  ;;  %v346_v51 = vsel %vm344_vm10, %v343_v48, %v341_v49  ;;  %v406_v49 = vld [vmem:[%s1434_s1] sm:$0xf] }
  0xbd   : > { %v347_v52 = vmul.f32 %v345_v50, %v1224_v24  ;;  %v348_v53 = vmul.f32 %v346_v51, %v1227_v25 }
  0xbf   : > { %349 = vst [vmem:[#allocation2 + $0x50] sm:$0xf] %v347_v52  ;;  %350 = vst [vmem:[#allocation2 + $0x58] sm:$0xf] %v348_v53  ;;  %v354_v56 = vpop.permute.xlu1 %353  ;;  %v352_v57 = vpop.permute.xlu0 %351 }
  0xc0   : > { %v356_v59 = vsel %vm355_vm13, %v352_v57, %v354_v56  ;;  %v357_v60 = vsel %vm355_vm13, %v354_v56, %v352_v57  ;;  %v393_v7 = vld [vmem:[#allocation2 + $0x28] sm:$0xff]  ;;  %v392_v22 = vld [vmem:[#allocation2 + $0x20] sm:$0xff] }
  0xc1   : > { %v389_v61 = vld [vmem:[#allocation2 + $0x8] sm:$0xff]  ;;  %v388_v62 = vld [vmem:[#allocation2] sm:$0xff]  ;;  %v358_v3 = vmul.f32 %v356_v59, %v1269_v54  ;;  %v359_v0 = vmul.f32 %v357_v60, %v1272_v55 }
  0xc2   : > { %v789_v4 = vpack.c.bf16 %v391_v58, %v389_v61  ;;  %v791_v5 = vpack.c.bf16 %v390_v63, %v388_v62  ;;  %v395_v8 = vld [vmem:[#allocation2 + $0x38] sm:$0xff]  ;;  %v394_v14 = vld [vmem:[#allocation2 + $0x30] sm:$0xff]  ;;  %v599_v59 = vld [vmem:[%s1437_s4] sm:$0xf] }
  0xc3   : > { %v360_v9 = vmul.f32 %v358_v3, %v1230_v27  ;;  %v361_v10 = vmul.f32 %v359_v0, %v1233_v28  ;;  %v367_v11 = vpop.permute.xlu1 %366  ;;  %v365_v12 = vpop.permute.xlu0 %364  ;;  %v793_v13 = vpack.c.bf16 %v395_v8, %v393_v7  ;;  %v795_v23 = vpack.c.bf16 %v394_v14, %v392_v22 }
  0xc4   : > { %790 = vmatprep.subr.bf16.mxu0 %v789_v4  ;;  %v369_v15 = vsel %vm368_vm14, %v365_v12, %v367_v11  ;;  %v370_v18 = vsel %vm368_vm14, %v367_v11, %v365_v12 }
  0xc5   : > { %792 = vmatpush1.bf16.msra.mxu0 %v791_v5  ;;  %362 = vst [vmem:[#allocation2 + $0x60] sm:$0xf] %v360_v9  ;;  %363 = vst [vmem:[#allocation2 + $0x68] sm:$0xf] %v361_v10  ;;  %v371_v20 = vmul.f32 %v369_v15, %v1269_v54  ;;  %v372_v21 = vmul.f32 %v370_v18, %v1272_v55 }
  0xc6   : > { %794 = vmatprep.subr.bf16.mxu0 %v793_v13  ;;  %v399_v26 = vld [vmem:[#allocation2 + $0x58] sm:$0xff]  ;;  %v398_v33 = vld [vmem:[#allocation2 + $0x50] sm:$0xff] }
  0xc7   : > { %373 = vst [vmem:[#allocation2 + $0x70] sm:$0xf] %v371_v20  ;;  %374 = vst [vmem:[#allocation2 + $0x78] sm:$0xf] %v372_v21  ;;  %v378_v29 = vpop.permute.xlu1 %377  ;;  %v376_v30 = vpop.permute.xlu0 %375  ;;  %v797_v31 = vpack.c.bf16 %v399_v26, %v397_v19  ;;  %v799_v38 = vpack.c.bf16 %v398_v33, %v396_v32 }
  0xc8   : > { %v380_v34 = vsel %vm379_vm15, %v376_v30, %v378_v29  ;;  %v381_v35 = vsel %vm379_vm15, %v378_v29, %v376_v30 }
  0xc9   : > { %796 = vmatpush1.bf16.msra.mxu0 %v795_v23  ;;  %v382_v36 = vmul.f32 %v380_v34, %v1269_v54  ;;  %v383_v37 = vmul.f32 %v381_v35, %v1272_v55 }
  0xca   : > { %798 = vmatprep.subr.bf16.mxu0 %v797_v31 }
  0xcb   : > { %v384_v39 = vmul.f32 %v382_v36, %v1224_v24  ;;  %v385_v40 = vmul.f32 %v383_v37, %v1227_v25 }
  0xcc   : > { %v401_v41 = vld [vmem:[#allocation2 + $0x68] sm:$0xff]  ;;  %v400_v43 = vld [vmem:[#allocation2 + $0x60] sm:$0xff] }
  0xcd   : > { %800 = vmatpush1.bf16.msra.mxu0 %v799_v38  ;;  %386 = vst [vmem:[#allocation2 + $0x80] sm:$0xf] %v384_v39  ;;  %387 = vst [vmem:[#allocation2 + $0x88] sm:$0xf] %v385_v40 }
  0xce   : > { %v403_v42 = vld [vmem:[#allocation2 + $0x78] sm:$0xff]  ;;  %v402_v44 = vld [vmem:[#allocation2 + $0x70] sm:$0xff] }
  0xcf   : > { %v801_v45 = vpack.c.bf16 %v403_v42, %v401_v41  ;;  %v803_v46 = vpack.c.bf16 %v402_v44, %v400_v43 }
  0xd1   : > { %802 = vmatprep.subr.bf16.mxu0 %v801_v45 }
  0xd2   : > { %804 = vmatpush1.bf16.msra.mxu0 %v803_v46 }
  0xd4   : > { %v405_v47 = vld [vmem:[#allocation2 + $0x88] sm:$0xff]  ;;  %v404_v48 = vld [vmem:[#allocation2 + $0x80] sm:$0xff] }
  0xd5   : > { %433 = vmatprep.subr.mxu0 %v405_v47 }
  0xd6   : > { %434 = vmatpush1.msra.mxu0 %v404_v48 }
  0xd7   : > { %780 = vmatmul.mubr.msk.f32.vlgmr.msra.gmra.mrb[0].mxu0 %vm413_vm0, %v406_v49 }
  0xd8   : > { %v411_v50 = vpop.permute.xlu0 %410 }
 0x1aa   : > { %v483_v51 = vpop.f32.mrb[0].mxu0 }
 0x1ab   : > { %v484_v52 = vadd.f32 %v483_v51, %v411_v50  ;;  %v485_v53 = vpop.f32.mrb[1].mxu0 }
 0x1ac   : > { %v486_v56 = vadd.f32 %v485_v53, %v411_v50 }
 0x1ad   : > { %v488_v57 = vmax.f32 %v484_v52, 0.0 }
 0x1ae   : > { %v489_v58 = vmax.f32 %v486_v56, 0.0 }
 0x1af   : > { %534 = vst [vmem:[#allocation2 + $0x40] sm:$0xf] %v488_v57  ;;  %502 = vrot.lane.b32.xlu0 %v488_v57, %s979_s29  ;;  %490 = vrot.lane.b32.xlu1 %v488_v57, %s980_s12 }
 0x1b0   : > { %535 = vst [vmem:[#allocation2 + $0x48] sm:$0xf] %v489_v58 }
 0x1b3   : > { %512 = vrot.lane.b32.xlu0 %v488_v57, %s981_s14  ;;  %492 = vrot.lane.b32.xlu1 %v489_v58, %s980_s12 }
 0x1b7   : > { %524 = vrot.lane.b32.xlu0 %v488_v57, %s982_s16  ;;  %504 = vrot.lane.b32.xlu1 %v489_v58, %s979_s29 }
 0x1bb   : > { %536 = vrot.lane.b32.xlu0 %v488_v57, %s983_s25  ;;  %514 = vrot.lane.b32.xlu1 %v489_v58, %s981_s14  ;;  %s788_s14 = sshll.u32 %s1040_s22, 7  ;;  %s988_s22 = smov [#allocation6]  }
 0x1bf   : > { %546 = vrot.lane.b32.xlu0 %v488_v57, %s984_s26  ;;  %526 = vrot.lane.b32.xlu1 %v489_v58, %s982_s16  ;;  %s240_s16 = scalar_lea.vmem [#allocation6], %s778_s17  ;;  %s913_s17 = sshll.u32 %s988_s22, 4  ;;  %s914_s17 = int_to_ptr.vmem [resolvable:$false] %s913_s17 }
 0x1c0   : > { %s915_s10 = scalar_lea.vmem %s914_s17, 256 }
 0x1c3   : > { %558 = vrot.lane.b32.xlu0 %v488_v57, %s985_s28  ;;  %538 = vrot.lane.b32.xlu1 %v489_v58, %s983_s25  ;;  %s701_s25 = sshll.u32 %s240_s16, 4  ;;  %s1391_s25 = int_to_ptr.vmem [resolvable:$true] %s701_s25 }
 0x1c4   : > { %s909_s9 = scalar_lea.vmem %s1391_s25, 128  ;;  %p916_p7 = scmp.lt.s32.totalorder %s1391_s25, %s914_s17 }
 0x1c5   : > { %p910_p6 = scmp.ne.s32.totalorder %s1391_s25, %s909_s9  ;;  %p917_p10 = scmp.lt.s32.totalorder %s915_s10, %s909_s9 }
 0x1c7   : > { %568 = vrot.lane.b32.xlu0 %v488_v57, %s986_s8  ;;  %548 = vrot.lane.b32.xlu1 %v489_v58, %s984_s26  ;;  %p911_p12 = pnand %p910_p6, %p1447_p11  ;;  %p918_p2 = por %p917_p10, %p916_p7 }
 0x1c9   : > { %p912_p13 = pneg %p911_p12 }
 0x1cb   : > { %602 = vperm.xlu0 %877, %v599_v59   ;;  %560 = vrot.lane.b32.xlu1 %v489_v58, %s985_s28  ;;  %p919_p4 = pnand %p918_p2, %p912_p13 }
 0x1cf   : > { %570 = vrot.lane.b32.xlu1 %v489_v58, %s986_s8  ;;  %s1389_s8 = scalar_lea.hbm %s1438_s5, %s788_s14 }
 0x221   : > { %v503_v60 = vpop.permute.xlu0 %502  ;;  %v491_v61 = vpop.permute.xlu1 %490 }
 0x225   : > { %v513_v62 = vpop.permute.xlu0 %512  ;;  %v493_v63 = vpop.permute.xlu1 %492 }
 0x226   : > { %v494_v3 = vsel %vm294_vm8, %v491_v61, %v493_v63  ;;  %v495_v0 = vsel %vm294_vm8, %v493_v63, %v491_v61 }
 0x227   : > { %v496_v4 = vmul.f32 %v495_v0, %v1210_v16  ;;  %v497_v5 = vmul.f32 %v494_v3, %v1213_v17  ;;  %v588_v0 = vld [vmem:[#allocation2 + $0x40] sm:$0xff] }
 0x229   : > { %v498_v7 = vmul.f32 %v496_v4, %v1230_v27  ;;  %v499_v8 = vmul.f32 %v497_v5, %v1233_v28  ;;  %v525_v9 = vpop.permute.xlu0 %524  ;;  %v505_v10 = vpop.permute.xlu1 %504 }
 0x22a   : > { %v506_v11 = vsel %vm307_vm2, %v503_v60, %v505_v10  ;;  %v507_v12 = vsel %vm307_vm2, %v505_v10, %v503_v60 }
 0x22b   : > { %500 = vst [vmem:[#allocation2] sm:$0xf] %v498_v7  ;;  %501 = vst [vmem:[#allocation2 + $0x8] sm:$0xf] %v499_v8  ;;  %v508_v13 = vmul.f32 %v507_v12, %v1210_v16  ;;  %v509_v14 = vmul.f32 %v506_v11, %v1213_v17 }
 0x22d   : > { %510 = vst [vmem:[#allocation2 + $0x10] sm:$0xf] %v508_v13  ;;  %511 = vst [vmem:[#allocation2 + $0x18] sm:$0xf] %v509_v14  ;;  %v515_v15 = vpop.permute.xlu1 %514  ;;  %v537_v20 = vpop.permute.xlu0 %536 }
 0x22e   : > { %v516_v18 = vsel %vm318_vm7, %v513_v62, %v515_v15  ;;  %v517_v19 = vsel %vm318_vm7, %v515_v15, %v513_v62 }
 0x22f   : > { %v518_v21 = vmul.f32 %v517_v19, %v1210_v16  ;;  %v519_v22 = vmul.f32 %v516_v18, %v1213_v17 }
 0x231   : > { %v520_v23 = vmul.f32 %v518_v21, %v1224_v24  ;;  %v521_v26 = vmul.f32 %v519_v22, %v1227_v25  ;;  %v527_v29 = vpop.permute.xlu1 %526  ;;  %v547_v36 = vpop.permute.xlu0 %546 }
 0x232   : > { %v528_v30 = vsel %vm331_vm9, %v525_v9, %v527_v29  ;;  %v529_v31 = vsel %vm331_vm9, %v527_v29, %v525_v9  ;;  %v581_v16 = vld [vmem:[#allocation2 + $0x8] sm:$0xff]  ;;  %v580_v17 = vld [vmem:[#allocation2] sm:$0xff] }
 0x233   : > { %522 = vst [vmem:[#allocation2 + $0x20] sm:$0xf] %v520_v23  ;;  %523 = vst [vmem:[#allocation2 + $0x28] sm:$0xf] %v521_v26  ;;  %v530_v32 = vmul.f32 %v529_v31, %v1230_v27  ;;  %v531_v33 = vmul.f32 %v528_v30, %v1233_v28 }
 0x234   : > { %v583_v34 = vld [vmem:[#allocation2 + $0x18] sm:$0xff]  ;;  %v582_v35 = vld [vmem:[#allocation2 + $0x10] sm:$0xff] }
 0x235   : > { %532 = vst [vmem:[#allocation2 + $0x30] sm:$0xf] %v530_v32  ;;  %533 = vst [vmem:[#allocation2 + $0x38] sm:$0xf] %v531_v33  ;;  %v539_v37 = vpop.permute.xlu1 %538  ;;  %v805_v38 = vpack.c.bf16 %v583_v34, %v581_v16  ;;  %v807_v39 = vpack.c.bf16 %v582_v35, %v580_v17  ;;  %v559_v47 = vpop.permute.xlu0 %558 }
 0x236   : > { %v540_v40 = vsel %vm344_vm10, %v537_v20, %v539_v37  ;;  %v541_v41 = vsel %vm344_vm10, %v539_v37, %v537_v20 }
 0x237   : > { %v542_v42 = vmul.f32 %v540_v40, %v1224_v24  ;;  %v543_v43 = vmul.f32 %v541_v41, %v1227_v25  ;;  %806 = vmatprep.subr.bf16.mxu1 %v805_v38 }
 0x238   : > { %808 = vmatpush1.bf16.msra.mxu1 %v807_v39 }
 0x239   : > { %544 = vst [vmem:[#allocation2 + $0x50] sm:$0xf] %v542_v42  ;;  %545 = vst [vmem:[#allocation2 + $0x58] sm:$0xf] %v543_v43  ;;  %v549_v44 = vpop.permute.xlu1 %548  ;;  %v569_v5 = vpop.permute.xlu0 %568 }
 0x23a   : > { %v550_v45 = vsel %vm355_vm13, %v547_v36, %v549_v44  ;;  %v551_v46 = vsel %vm355_vm13, %v549_v44, %v547_v36  ;;  %v585_v50 = vld [vmem:[#allocation2 + $0x28] sm:$0xff]  ;;  %v584_v52 = vld [vmem:[#allocation2 + $0x20] sm:$0xff] }
 0x23b   : > { %v552_v48 = vmul.f32 %v550_v45, %v1269_v54  ;;  %v553_v49 = vmul.f32 %v551_v46, %v1272_v55 }
 0x23c   : > { %v587_v51 = vld [vmem:[#allocation2 + $0x38] sm:$0xff]  ;;  %v586_v53 = vld [vmem:[#allocation2 + $0x30] sm:$0xff] }
 0x23d   : > { %v554_v56 = vmul.f32 %v552_v48, %v1230_v27  ;;  %v555_v57 = vmul.f32 %v553_v49, %v1233_v28  ;;  %v561_v58 = vpop.permute.xlu1 %560  ;;  %v809_v59 = vpack.c.bf16 %v587_v51, %v585_v50  ;;  %v811_v60 = vpack.c.bf16 %v586_v53, %v584_v52  ;;  %v589_v27 = vld [vmem:[#allocation2 + $0x48] sm:$0xff] }
 0x23e   : > { %v562_v61 = vsel %vm368_vm14, %v559_v47, %v561_v58  ;;  %v563_v62 = vsel %vm368_vm14, %v561_v58, %v559_v47 }
 0x23f   : > { %556 = vst [vmem:[#allocation2 + $0x60] sm:$0xf] %v554_v56  ;;  %557 = vst [vmem:[#allocation2 + $0x68] sm:$0xf] %v555_v57  ;;  %v564_v63 = vmul.f32 %v562_v61, %v1269_v54  ;;  %v565_v3 = vmul.f32 %v563_v62, %v1272_v55  ;;  %810 = vmatprep.subr.bf16.mxu1 %v809_v59 }
 0x240   : > { %812 = vmatpush1.bf16.msra.mxu1 %v811_v60  ;;  %v591_v28 = vld [vmem:[#allocation2 + $0x58] sm:$0xff]  ;;  %v590_v4 = vld [vmem:[#allocation2 + $0x50] sm:$0xff] }
 0x241   : > { %566 = vst [vmem:[#allocation2 + $0x70] sm:$0xf] %v564_v63  ;;  %567 = vst [vmem:[#allocation2 + $0x78] sm:$0xf] %v565_v3  ;;  %v571_v7 = vpop.permute.xlu1 %570  ;;  %v813_v8 = vpack.c.bf16 %v591_v28, %v589_v27  ;;  %v815_v9 = vpack.c.bf16 %v590_v4, %v588_v0 }
 0x242   : > { %v572_v10 = vsel %vm379_vm15, %v569_v5, %v571_v7  ;;  %v573_v11 = vsel %vm379_vm15, %v571_v7, %v569_v5 }
 0x243   : > { %v574_v12 = vmul.f32 %v572_v10, %v1269_v54  ;;  %v575_v13 = vmul.f32 %v573_v11, %v1272_v55  ;;  %814 = vmatprep.subr.bf16.mxu1 %v813_v8 }
 0x244   : > { %816 = vmatpush1.bf16.msra.mxu1 %v815_v9 }
 0x245   : > { %v576_v14 = vmul.f32 %v574_v12, %v1224_v24  ;;  %v577_v15 = vmul.f32 %v575_v13, %v1227_v25  ;;  %v598_v24 = vld [vmem:[%s1435_s2] sm:$0xf] }
 0x246   : > { %v593_v18 = vld [vmem:[#allocation2 + $0x68] sm:$0xff]  ;;  %v592_v20 = vld [vmem:[#allocation2 + $0x60] sm:$0xff] }
 0x247   : > { %578 = vst [vmem:[#allocation2 + $0x80] sm:$0xf] %v576_v14  ;;  %579 = vst [vmem:[#allocation2 + $0x88] sm:$0xf] %v577_v15 }
 0x248   : > { %v595_v19 = vld [vmem:[#allocation2 + $0x78] sm:$0xff]  ;;  %v594_v21 = vld [vmem:[#allocation2 + $0x70] sm:$0xff] }
 0x249   : > { %v817_v22 = vpack.c.bf16 %v595_v19, %v593_v18  ;;  %v819_v6 = vpack.c.bf16 %v594_v21, %v592_v20 }
 0x24a   : > { %v603_v25 = vpop.permute.xlu0 %602 }
 0x24b   : > { %818 = vmatprep.subr.bf16.mxu1 %v817_v22 }
 0x24c   : > { %820 = vmatpush1.bf16.msra.mxu1 %v819_v6 }
 0x24e   : > { %v597_v54 = vld [vmem:[#allocation2 + $0x88] sm:$0xff]  ;;  %v596_v55 = vld [vmem:[#allocation2 + $0x80] sm:$0xff] }
 0x24f   : > { %624 = vmatprep.subr.mxu1 %v597_v54 }
 0x250   : > { %625 = vmatpush1.msra.mxu1 %v596_v55 }
 0x251   : > { %781 = vmatmul.mubr.msk.f32.vlgmr.msra.gmra.mrb[0].mxu1 %vm413_vm0, %v598_v24 }
 0x324   : > { %v674_v23 = vpop.f32.mrb[0].mxu1 }
 0x325   : > { %v675_v26 = vadd.f32 %v674_v23, %v603_v25  ;;  %v676_v29 = vpop.f32.mrb[1].mxu1 }
 0x326   : > { %v677_v30 = vadd.f32 %v676_v29, %v603_v25 }
 0x327   : > { %v679_v31 = vadd.f32 %v675_v26, %v1154_v1 }
 0x328   : > { %v680_v32 = vadd.f32 %v677_v30, %v1162_v2 }
 0x32a   : > { %v683_v33 = vcombine.low %v679_v31, %v680_v32 }
 0x32c   : > { %685 = vst [vmem:[%s240_s16] sm:$0xff] %v683_v33 }
 0x32d   : > { %922 = shalt.err (!%p919_p4)
}
 0x32e   : > { %s923_s13 = scalar_lea.hbm %s1389_s8, 128  ;;  %s927_s15 = scalar_lea.hbm %s1438_s5, 256 }
 0x32f   : > { %p924_p5 = scmp.ne.s32.totalorder %s1389_s8, %s923_s13  ;;  %p928_p0 = scmp.lt.u32.totalorder %s1389_s8, %s1438_s5 }
 0x330   : > { %p929_p1 = scmp.lt.u32.totalorder %s927_s15, %s923_s13  ;;  %p931_p6 = scmp.lt.u32.totalorder %s923_s13, %s1389_s8 }
 0x331   : > { %p925_p8 = pnand %p924_p5, %p1447_p11 }
 0x332   : > { %p930_p3 = por %p929_p1, %p928_p0 }
 0x333   : > { %p926_p9 = pneg %p925_p8 }
 0x334   : > { %p932_p12 = por %p931_p6, %p930_p3 }
 0x336   : > { %p933_p13 = pnand %p932_p12, %p926_p9 }
 0x338   : > { %936 = shalt.err (!%p933_p13)
}
 0x339   : > { %823 = dma.vmem_to_hbm [thread:$0]  (%p1447_p11), %s1391_s25, 128, %s1389_s8, %s687_s7  }
 0x33a PF: > { %s713_s14 = sand.u32 1, %s963_s18   ;;  %p1448_p7 = scmp.ne.s32.totalorder %s1443_s6, 0 }
 0x33b   : > { %p1449_p10 = scmp.ge.s32.totalorder %s975_s21, 2  ;;  %s714_s16 = scalar_lea.sflag [#allocation5], %s713_s14 }
 0x33d   : > { %p830_p2 = pnand %p1449_p10, %p1448_p7 }
 0x33f   : > { %958 = dma.done.wait (!%p830_p2), %s714_s16, 128  }
 0x340   : > { %960 = vsyncadd (!%p830_p2), %s714_s16, 4294967168  ;;  %p18_p4 = scmp.ge.s32.totalorder %s1044_s24, 4   ;;  %s1450_s18 = smov %s967_s19 }
 0x341   : > { %s1451_s19 = smov %s971_s20  ;;  %s1452_s20 = smov %s1056_s27 }
 0x342   : > { %s1453_s21 = smov %s1044_s24  ;;  %20 = sbr.rel (!%p18_p4) target bundleno = 5 (0x5), region = 85 }
 0x349   :  { %719 = vsyncpa [#allocation4], 1 }
 0x34a   :  { %721 = vsyncpa [#allocation4 + $0x1], 1 }
 0x34b   :  { %722 = vsyncpa [#allocation5], 1 }
 0x34c   :  { %724 = vsyncpa [#allocation5 + $0x1], 1 }

</bundles_post_ra>
